<compile_context>
chip_gen: v7x
topology: tpu7x:2x2x1
jax: 0.10.0
libtpu: 0.0.40
codegen_flags: <defaults>
</compile_context>

<pallas_src>
import functools

import jax
import jax.numpy as jnp
from jax.experimental import pallas as pl
from jax.experimental.pallas import tpu as pltpu

K_ITERS = 5
ALPHA = 0.1
COMB = 0.001          # coefficient of both the offset MLP and mlp_A terms


def _round_up(x, m):
    return ((x + m - 1) // m) * m


# --------------------------------------------------------------------------
# Kernel 1: fused 2-layer MLP  (h1 | h2 | 0.001*(off + amat)), row-tiled.
# --------------------------------------------------------------------------
def fused_mlp_kernel(x_ref, w1_ref, b1_ref, w2_ref, b2_ref, o_ref):
    h = jnp.dot(x_ref[...], w1_ref[...], preferred_element_type=jnp.float32)
    h = jnp.maximum(h + b1_ref[...], 0.0)
    o_ref[...] = (jnp.dot(h, w2_ref[...], preferred_element_type=jnp.float32)
                  + b2_ref[...])


# --------------------------------------------------------------------------
# Kernel 2: one APPNP iteration in transposed layout.
#   zT_new[:, d] = (1-alpha) * sum_s zT[:, s] @ PT[s, d] + alpha * hT[:, d]
# grid = (dst_tiles [parallel], src_tiles [arbitrary, reduction last]).
# PT is bf16 and streamed; the accumulator is f32 VMEM scratch.
# --------------------------------------------------------------------------
def appnp_step_kernel(zT_ref, hT_ref, pT_ref, out_ref, acc_ref):
    s = pl.program_id(1)

    @pl.when(s == 0)
    def _():
        acc_ref[...] = jnp.zeros_like(acc_ref)

    zb = zT_ref[...].astype(jnp.bfloat16)                    # [OP, nt] bf16 LHS
    acc_ref[...] += jnp.dot(zb, pT_ref[...],
                            preferred_element_type=jnp.float32)

    @pl.when(s == pl.num_programs(1) - 1)
    def _():
        out_ref[...] = (1.0 - ALPHA) * acc_ref[...] + ALPHA * hT_ref[...]


# --------------------------------------------------------------------------
# Kernel 3: combine + log_softmax over the class axis, transposed layout.
# --------------------------------------------------------------------------
def combine_kernel(z1_ref, z2_ref, b_ref, o_ref, *, num_classes):
    y = z1_ref[...] - z2_ref[...] + b_ref[...]               # [OP, nt]
    cls = jax.lax.broadcasted_iota(jnp.int32, y.shape, 0)
    valid = cls < num_classes                                # mask padded classes
    ym = jnp.where(valid, y, -1e30)
    m = jnp.max(ym, axis=0, keepdims=True)
    e = jnp.where(valid, jnp.exp(ym - m), 0.0)
    lse = jnp.log(jnp.sum(e, axis=0, keepdims=True))
    o_ref[...] = y - m - lse


# --------------------------------------------------------------------------
# Wrapper: padding, weight fusion, pallas_call plumbing.
# --------------------------------------------------------------------------
def dualgnn_forward(x, A, PT1, PT2, params, *, node_tile=512):
    """x:[N,F_in] f32, A:[N,1] f32, PT{1,2}:[N,N] f32 transposed propagation
    matrices (PT[src,dst]).  Returns log-probs [N, out_dim]."""
    assert node_tile % 128 == 0
    f32 = jnp.float32

    N, F_in = x.shape
    a_dim = A.shape[1]
    hid = params["w11"].shape[1]
    out_dim = params["w12"].shape[1]

    nt = node_tile
    N_pad = _round_up(N, nt)
    Dn = N_pad // nt

    OP = _round_up(out_dim, 16)          # padded class dim (bf16-friendly sublanes)
    FA = F_in + a_dim
    FA_P = _round_up(FA, 128)
    H1 = 6 * hid                         # hid + hid + 2*hid + 2*hid
    H1_P = _round_up(H1, 128)
    O3_P = _round_up(3 * OP, 128)

    # ---- fuse the four MLPs into one block-diagonal 2-layer MLP (glue) ----
    W1 = jnp.zeros((FA_P, H1_P), f32)
    W1 = W1.at[:F_in, 0 * hid:1 * hid].set(params["w11"])
    W1 = W1.at[:F_in, 1 * hid:2 * hid].set(params["w21"])
    W1 = W1.at[:F_in, 2 * hid:4 * hid].set(params["wo1"])
    W1 = W1.at[F_in:F_in + a_dim, 4 * hid:6 * hid].set(params["wa1"])
    B1 = jnp.zeros((1, H1_P), f32)
    B1 = B1.at[:, 0 * hid:1 * hid].set(params["b11"])
    B1 = B1.at[:, 1 * hid:2 * hid].set(params["b21"])
    B1 = B1.at[:, 2 * hid:4 * hid].set(params["bo1"])
    B1 = B1.at[:, 4 * hid:6 * hid].set(params["ba1"])

    W2 = jnp.zeros((H1_P, O3_P), f32)
    W2 = W2.at[0 * hid:1 * hid, 0 * OP:0 * OP + out_dim].set(params["w12"])
    W2 = W2.at[1 * hid:2 * hid, 1 * OP:1 * OP + out_dim].set(params["w22"])
    W2 = W2.at[2 * hid:4 * hid, 2 * OP:2 * OP + out_dim].set(COMB * params["wo2"])
    W2 = W2.at[4 * hid:6 * hid, 2 * OP:2 * OP + out_dim].set(COMB * params["wa2"])
    B2 = jnp.zeros((1, O3_P), f32)
    B2 = B2.at[:, 0 * OP:0 * OP + out_dim].set(params["b12"])
    B2 = B2.at[:, 1 * OP:1 * OP + out_dim].set(params["b22"])
    B2 = B2.at[:, 2 * OP:2 * OP + out_dim].set(COMB * (params["bo2"] + params["ba2"]))

    # ---- pad node-dim inputs ----
    Xa = jnp.zeros((N_pad, FA_P), f32)
    Xa = Xa.at[:N, :F_in].set(x)
    Xa = Xa.at[:N, F_in:F_in + a_dim].set(A)

    def pad_pt(PT):                      # bf16 storage, zero-padded
        out = jnp.zeros((N_pad, N_pad), jnp.bfloat16)
        return out.at[:N, :N].set(PT.astype(jnp.bfloat16))

    PT1b, PT2b = pad_pt(PT1), pad_pt(PT2)

    # ---- kernel 1: fused MLP, row-tiled ----
    Hcat = pl.pallas_call(
        fused_mlp_kernel,
        out_shape=jax.ShapeDtypeStruct((N_pad, O3_P), f32),
        grid=(Dn,),
        in_specs=[
            pl.BlockSpec((nt, FA_P), lambda i: (i, 0)),
            pl.BlockSpec((FA_P, H1_P), lambda i: (0, 0)),
            pl.BlockSpec((1, H1_P), lambda i: (0, 0)),
            pl.BlockSpec((H1_P, O3_P), lambda i: (0, 0)),
            pl.BlockSpec((1, O3_P), lambda i: (0, 0)),
        ],
        out_specs=pl.BlockSpec((nt, O3_P), lambda i: (i, 0)),
        compiler_params=pltpu.CompilerParams(dimension_semantics=("parallel",)),
    )(Xa, W1, B1, W2, B2)

    # transpose once in the wrapper: propagation runs in [OP, N] layout
    h1T = Hcat[:, 0 * OP:1 * OP].T                    # [OP, N_pad] f32
    h2T = Hcat[:, 1 * OP:2 * OP].T
    baseT = Hcat[:, 2 * OP:3 * OP].T                  # 0.001*(off + amat)

    # ---- kernel 2: APPNP propagation, one pallas_call per K iteration ----
    appnp_step = pl.pallas_call(
        appnp_step_kernel,
        out_shape=jax.ShapeDtypeStruct((OP, N_pad), f32),
        grid=(Dn, Dn),                                 # (dst tiles, src tiles)
        in_specs=[
            pl.BlockSpec((OP, nt), lambda d, s: (0, s)),   # zT (prev iterate)
            pl.BlockSpec((OP, nt), lambda d, s: (0, d)),   # hT (teleport term)
            pl.BlockSpec((nt, nt), lambda d, s: (s, d)),   # PT block, bf16 stream
        ],
        out_specs=pl.BlockSpec((OP, nt), lambda d, s: (0, d)),
        scratch_shapes=[pltpu.VMEM((OP, nt), f32)],
        compiler_params=pltpu.CompilerParams(
            dimension_semantics=("parallel", "arbitrary"),
            vmem_limit_bytes=48 * 1024 * 1024),
    )

    def propagate(hT, PTb):
        zT = hT
        for _ in range(K_ITERS):
            zT = appnp_step(zT, hT, PTb)
        return zT

    z1T = propagate(h1T, PT1b)       # net1 fully, then net2: only one P family
    z2T = propagate(h2T, PT2b)       # of tiles is streamed/resident at a time

    # ---- kernel 3: combine + log_softmax (lane-dense, transposed) ----
    cspec = pl.BlockSpec((OP, nt), lambda i: (0, i))
    yT = pl.pallas_call(
        functools.partial(combine_kernel, num_classes=out_dim),
        out_shape=jax.ShapeDtypeStruct((OP, N_pad), f32),
        grid=(Dn,),
        in_specs=[cspec, cspec, cspec],
        out_specs=cspec,
        compiler_params=pltpu.CompilerParams(dimension_semantics=("parallel",)),
    )(z1T, z2T, baseT)

    return yT[:out_dim, :N].T


# ---------------------------- plain-JAX glue ----------------------------

def gcn_norm_dense_T(edge_index, re_edge_weight, num_nodes):
    """Self loops + gcn_norm + DualGNN re-weighting; returns TRANSPOSED dense
    propagation matrices PT[source, target] (so the kernel needs no transpose)."""
    # TODO(synk): the irregular scatter-add of gcn_norm stays in plain JAX; it has
    # no clean dense-tile Pallas equivalent (the kernels consume the dense P).
    src, dst = edge_index[0], edge_index[1]
    loop = jnp.arange(num_nodes, dtype=src.dtype)
    src_f = jnp.concatenate([src, loop])
    dst_f = jnp.concatenate([dst, loop])
    w = jnp.ones(src_f.shape[0], jnp.float32)
    deg = jnp.zeros((num_nodes,), jnp.float32).at[dst_f].add(w)
    dinv = jnp.where(deg > 0.0, deg ** -0.5, 0.0)
    gcn_w = dinv[src_f] * w * dinv[dst_f]

    re = re_edge_weight.reshape(-1)
    w1 = 1e-4 + 0.9999 * ((1e-4 + re * 0.9998) * gcn_w)
    w2 = 1e-4 + 0.9999 * ((0.9999 - re * 0.9998) * gcn_w)

    PT1 = jnp.zeros((num_nodes, num_nodes), jnp.float32).at[src_f, dst_f].add(w1)
    PT2 = jnp.zeros((num_nodes, num_nodes), jnp.float32).at[src_f, dst_f].add(w2)
    return PT1, PT2


def reference_forward(x, A, PT1, PT2, params):
    """Full-f32 module semantics (P in f32, HIGHEST precision)."""
    hp = jax.lax.Precision.HIGHEST

    def mlp(inp, w1, b1, w2, b2):
        h = jnp.maximum(jnp.dot(inp, w1, precision=hp) + b1, 0.0)
        return jnp.dot(h, w2, precision=hp) + b2

    def appnp(h, PT):
        P = PT.T
        z = h
        for _ in range(K_ITERS):
            z = (1.0 - ALPHA) * jnp.dot(P, z, precision=hp) + ALPHA * h
        return z

    h1 = mlp(x, params["w11"], params["b11"], params["w12"], params["b12"])
    h2 = mlp(x, params["w21"], params["b21"], params["w22"], params["b22"])
    off = mlp(x, params["wo1"], params["bo1"], params["wo2"], params["bo2"])
    am = mlp(A, params["wa1"], params["ba1"], params["wa2"], params["ba2"])
    y = appnp(h1, PT1) - appnp(h2, PT2) + COMB * off + COMB * am
    return jax.nn.log_softmax(y, axis=1)


def init_params(key, input_dim, hidden_dim, output_dim, a_dim=1):
    ks = jax.random.split(key, 16)

    def w(k, shape, scale=0.1):
        return (scale * jax.random.normal(k, shape)).astype(jnp.float32)

    return {
        # net1.mlp
        "w11": w(ks[0], (input_dim, hidden_dim)), "b11": w(ks[1], (1, hidden_dim), 0.01),
        "w12": w(ks[2], (hidden_dim, output_dim)), "b12": w(ks[3], (1, output_dim), 0.01),
        # net2.mlp
        "w21": w(ks[4], (input_dim, hidden_dim)), "b21": w(ks[5], (1, hidden_dim), 0.01),
        "w22": w(ks[6], (hidden_dim, output_dim)), "b22": w(ks[7], (1, output_dim), 0.01),
        # offset_mlp
        "wo1": w(ks[8], (input_dim, 2 * hidden_dim)), "bo1": w(ks[9], (1, 2 * hidden_dim), 0.01),
        "wo2": w(ks[10], (2 * hidden_dim, output_dim)), "bo2": w(ks[11], (1, output_dim), 0.01),
        # mlp_A
        "wa1": w(ks[12], (a_dim, 2 * hidden_dim)), "ba1": w(ks[13], (1, 2 * hidden_dim), 0.01),
        "wa2": w(ks[14], (2 * hidden_dim, output_dim)), "ba2": w(ks[15], (1, output_dim), 0.01),
    }


if __name__ == "__main__":
    N, F_IN, HID, OUT, A_DIM, E = 512, 32, 16, 8, 1, 2048

    key = jax.random.PRNGKey(0)
    kx, ka, ke1, ke2, kre, kp = jax.random.split(key, 6)

    x = jax.random.normal(kx, (N, F_IN), jnp.float32)
    A = jax.random.normal(ka, (N, A_DIM), jnp.float32)

    src = jax.random.randint(ke1, (E,), 0, N)
    dst = jax.random.randint(ke2, (E,), 0, N)
    dst = jnp.where(dst == src, (dst + 1) % N, dst)      # no self loops in raw edges
    edge_index = jnp.stack([src, dst], axis=0)

    re_edge_weight = jax.random.uniform(kre, (E + N,), jnp.float32)  # per edge+self-loop

    params = init_params(kp, F_IN, HID, OUT, A_DIM)

    PT1, PT2 = gcn_norm_dense_T(edge_index, re_edge_weight, N)

    out = dualgnn_forward(x, A, PT1, PT2, params, node_tile=128)
    out = jax.block_until_ready(out)

    ref = jax.block_until_ready(reference_forward(x, A, PT1, PT2, params))
    assert out.shape == (N, OUT)
    # P (and the z operand of P@z) is streamed in bf16 per the perf review; the
    # accumulation is f32, so log-probs match the full-f32 reference within 5e-2.
    assert jnp.max(jnp.abs(out - ref)) < 5e-2, "kernel does not match JAX reference"

    print("KERNEL_OK")
</pallas_src>

<mosaic_0001>
module attributes {stable_mosaic.version = 11 : i64} {
  func.func @fused_mlp_kernel(%arg0: i32, %arg1: memref<128x128xf32, #tpu.memory_space<vmem>>, %arg2: memref<128x128xf32, #tpu.memory_space<vmem>>, %arg3: memref<1x128xf32, #tpu.memory_space<vmem>>, %arg4: memref<128x128xf32, #tpu.memory_space<vmem>>, %arg5: memref<1x128xf32, #tpu.memory_space<vmem>>, %arg6: memref<128x128xf32, #tpu.memory_space<vmem>>) attributes {dimension_semantics = [#tpu.dimension_semantics<parallel>], iteration_bounds = array<i64: 4>, scalar_prefetch = 0 : i64, scratch_operands = 0 : i64, tpu.core_type = #tpu.core_type<tc>, window_params = [{transform_indices = @transform_0, window_bounds = array<i64: 128, 128>}, {pipeline_mode = #tpu.pipeline_mode<synchronous>, transform_indices = @transform_1, window_bounds = array<i64: 128, 128>}, {pipeline_mode = #tpu.pipeline_mode<synchronous>, transform_indices = @transform_2, window_bounds = array<i64: 1, 128>}, {pipeline_mode = #tpu.pipeline_mode<synchronous>, transform_indices = @transform_3, window_bounds = array<i64: 128, 128>}, {pipeline_mode = #tpu.pipeline_mode<synchronous>, transform_indices = @transform_4, window_bounds = array<i64: 1, 128>}, {transform_indices = @transform_5, window_bounds = array<i64: 128, 128>}]} {
    %c0 = arith.constant 0 : index
    %c0_0 = arith.constant 0 : index
    %0 = vector.load %arg1[%c0, %c0_0] : memref<128x128xf32, #tpu.memory_space<vmem>>, vector<128x128xf32>
    %c0_1 = arith.constant 0 : index
    %c0_2 = arith.constant 0 : index
    %1 = vector.load %arg2[%c0_1, %c0_2] : memref<128x128xf32, #tpu.memory_space<vmem>>, vector<128x128xf32>
    %cst = arith.constant dense<0.000000e+00> : vector<128x128xf32>
    %2 = tpu.matmul %0, %1, %cst {dimension_numbers = #tpu.dot_dimension_numbers<[1], [0], [0], [1], [0, 0, 1, 1], [], []>} : vector<128x128xf32>, vector<128x128xf32>, vector<128x128xf32> -> vector<128x128xf32>
    %c0_3 = arith.constant 0 : index
    %c0_4 = arith.constant 0 : index
    %3 = vector.load %arg3[%c0_3, %c0_4] : memref<1x128xf32, #tpu.memory_space<vmem>>, vector<1x128xf32>
    %4 = vector.broadcast %3 : vector<1x128xf32> to vector<128x128xf32>
    %5 = arith.addf %2, %4 : vector<128x128xf32>
    %cst_5 = arith.constant 0.000000e+00 : f32
    %6 = vector.broadcast %cst_5 : f32 to vector<128x128xf32>
    %7 = arith.maximumf %5, %6 : vector<128x128xf32>
    %c0_6 = arith.constant 0 : index
    %c0_7 = arith.constant 0 : index
    %8 = vector.load %arg4[%c0_6, %c0_7] : memref<128x128xf32, #tpu.memory_space<vmem>>, vector<128x128xf32>
    %cst_8 = arith.constant dense<0.000000e+00> : vector<128x128xf32>
    %9 = tpu.matmul %7, %8, %cst_8 {dimension_numbers = #tpu.dot_dimension_numbers<[1], [0], [0], [1], [0, 0, 1, 1], [], []>} : vector<128x128xf32>, vector<128x128xf32>, vector<128x128xf32> -> vector<128x128xf32>
    %c0_9 = arith.constant 0 : index
    %c0_10 = arith.constant 0 : index
    %10 = vector.load %arg5[%c0_9, %c0_10] : memref<1x128xf32, #tpu.memory_space<vmem>>, vector<1x128xf32>
    %11 = vector.broadcast %10 : vector<1x128xf32> to vector<128x128xf32>
    %12 = arith.addf %9, %11 : vector<128x128xf32>
    %c0_11 = arith.constant 0 : index
    %c0_12 = arith.constant 0 : index
    %13 = vector.load %arg6[%c0_11, %c0_12] : memref<128x128xf32, #tpu.memory_space<vmem>>, vector<128x128xf32>
    tpu.vector_store %arg6[%c0_11, %c0_12], %12 {strides = array<i32>} : memref<128x128xf32, #tpu.memory_space<vmem>>, vector<128x128xf32>,
    return
  }
  func.func @transform_0(%arg0: i32) -> (i32, i32) {
    %c0_i32 = arith.constant 0 : i32
    %c0_i32_0 = arith.constant 0 : i32
    return %arg0, %c0_i32 : i32, i32
  }
  func.func @transform_1(%arg0: i32) -> (i32, i32) {
    %c0_i32 = arith.constant 0 : i32
    %c0_i32_0 = arith.constant 0 : i32
    %c0_i32_1 = arith.constant 0 : i32
    return %c0_i32, %c0_i32_0 : i32, i32
  }
  func.func @transform_2(%arg0: i32) -> (i32, i32) {
    %c0_i32 = arith.constant 0 : i32
    %c0_i32_0 = arith.constant 0 : i32
    %c0_i32_1 = arith.constant 0 : i32
    return %c0_i32, %c0_i32_0 : i32, i32
  }
  func.func @transform_3(%arg0: i32) -> (i32, i32) {
    %c0_i32 = arith.constant 0 : i32
    %c0_i32_0 = arith.constant 0 : i32
    %c0_i32_1 = arith.constant 0 : i32
    return %c0_i32, %c0_i32_0 : i32, i32
  }
  func.func @transform_4(%arg0: i32) -> (i32, i32) {
    %c0_i32 = arith.constant 0 : i32
    %c0_i32_0 = arith.constant 0 : i32
    %c0_i32_1 = arith.constant 0 : i32
    return %c0_i32, %c0_i32_0 : i32, i32
  }
  func.func @transform_5(%arg0: i32) -> (i32, i32) {
    %c0_i32 = arith.constant 0 : i32
    %c0_i32_0 = arith.constant 0 : i32
    return %arg0, %c0_i32 : i32, i32
  }
}

</mosaic_0001>

<bundles_post_ra>
// kernel: tpu_custom_call.1
= control target key start
LH: loop header
LB: loop body
LE: loop exit
PB: predicated region body
PF: predicated region fallthrough
CT: control target
= control target key end

     0   :  { %10 = vsyncpa [#allocation3], 0  ;;  %s1574_s0 = inlined_call_operand.hbm [shape: f32[512,128], index: 0, kind: input, shape index: {}]   ;;  %s1575_s1 = inlined_call_operand.hbm [shape: f32[128,128], index: 1, kind: input, shape index: {}]   ;;  %s1576_s2 = inlined_call_operand.vmem [shape: f32[1,128], index: 2, kind: input, shape index: {}]   ;;  %s1577_s3 = inlined_call_operand.hbm [shape: f32[128,128], index: 3, kind: input, shape index: {}]   ;;  %s1578_s4 = inlined_call_operand.vmem [shape: f32[1,128], index: 4, kind: input, shape index: {}]   ;;  %s1579_s5 = inlined_call_operand.hbm [shape: f32[512,128], index: 5, kind: output, shape index: {}]  }
   0x1   :  { %12 = vsyncpa [#allocation3 + $0x1], 0 }
   0x2   :  { %13 = vsyncpa [#allocation6], 0 }
   0x3   :  { %14 = vsyncpa [#allocation4], 0 }
   0x4   :  { %16 = vsyncpa [#allocation4 + $0x1], 0  ;;  %s1293_s18 = smov 0   ;;  %s1295_s19 = smov 0  }
   0x5   :  { %s1297_s20 = smov 0   ;;  %s1299_s21 = smov 0  }
   0x6 LB: > { %s1314_s22 = sadd.s32 4294967295, %s1253_s21   ;;  %s764_s23 = sadd.s32 4294967294, %s1253_s21   ;;  %s1253_s21 = sphi %s1299_s21, %s1598_s21   ;;  %s1249_s20 = sphi %s1297_s20, %s1597_s20   ;;  %s1245_s19 = sphi %s1295_s19, %s1596_s19   ;;  %s1241_s18 = sphi %s1293_s18, %s1595_s18  }
   0x7   : > { %p42_p0 = scmp.ne.s32.totalorder %s1245_s19, %s1241_s18  ;;  %p1580_p1 = scmp.eq.s32.totalorder %s1314_s22, 0 }
   0x8   : > { %p156_p3 = scmp.eq.s32.totalorder %s764_s23, 3  ;;  %p765_p5 = scmp.ge.s32.totalorder %s1253_s21, 1 }
   0x9   : > { %p1323_p4 = por %p1580_p1, %p42_p0  ;;  %p163_p7 = scmp.lt.s32.totalorder %s1253_s21, 5 }
   0xa   : > { %p1328_p6 = por %p156_p3, %p42_p0  ;;  %s1255_s27 = smov [#allocation5]  }
   0xb   : > { %s1583_s24 = scalar_select %p1323_p4, 1, 0 }
   0xc   : > { %s1584_s25 = scalar_select %p1328_p6, 1, 0 }
   0xd   : > { %p1333_p8 = pnand %p765_p5, %p163_p7  ;;  %s175_s28 = sshll.u32 %s1255_s27, 4  ;;  %s176_s28 = int_to_ptr.vmem [resolvable:$true] %s175_s28 }
   0xe   : > { %s1256_s30 = smov [#allocation7]   ;;  %s1097_s9 = scalar_lea.hbm %s1575_s1, 2048 }
   0xf   : > { %s1585_s26 = scalar_select %p1333_p8, 1, 0 }
  0x10   : > { %p1038_p9 = pneg %p1333_p8  ;;  %s191_s6 = sshll.u32 %s1256_s30, 4  ;;  %s1345_s6 = int_to_ptr.vmem [resolvable:$true] %s191_s6 }
  0x11   : > { %p1098_p11 = scmp.ne.s32.totalorder %s1575_s1, %s1097_s9  ;;  %p1104_p3 = scmp.lt.u32.totalorder %s1097_s9, %s1575_s1 }
  0x12   : > { %p1341_p10 = pnand %p1038_p9, %p1580_p1 }
  0x14   : > { %p1099_p12 = pneg %p1341_p10 }
  0x16   : > { %p1100_p13 = pnand %p1099_p12, %p1098_p11 }
  0x18   : > { %p1101_p0 = pneg %p1100_p13 }
  0x1a   : > { %p1106_p5 = pnand %p1104_p3, %p1101_p0 }
  0x1c   : > { %1109 = shalt.err (!%p1106_p5)
}
  0x1d   : > { %s1110_s14 = scalar_lea.vmem %s176_s28, 2048  ;;  %p1118_p2 = scmp.lt.s32.totalorder %s176_s28, %s176_s28 }
  0x1e   : > { %p1111_p7 = scmp.ne.s32.totalorder %s176_s28, %s1110_s14  ;;  %p1119_p6 = scmp.lt.s32.totalorder %s1110_s14, %s1110_s14 }
  0x20   : > { %p1113_p9 = pnand %p1111_p7, %p1099_p12  ;;  %p1120_p4 = por %p1119_p6, %p1118_p2 }
  0x22   : > { %p1114_p1 = pneg %p1113_p9 }
  0x24   : > { %p1121_p8 = pnand %p1120_p4, %p1114_p1 }
  0x26   : > { %1124 = shalt.err (!%p1121_p8)
}
  0x27   : > { %s1257_s15 = smov 128   ;;  %s1258_s16 = smov 8  }
  0x28   : > { %1041 = dma.hbm_to_vmem [thread:$0]  (!%p1341_p10), %s1575_s1, 2048, %s176_s28, [#allocation6], %s1257_s15, %s1257_s15, %s1258_s16  }
  0x29   : > { %s1125_s7 = scalar_lea.hbm %s1577_s3, 2048 }
  0x2a   : > { %p1126_p1 = scmp.ne.s32.totalorder %s1577_s3, %s1125_s7  ;;  %p1132_p6 = scmp.lt.u32.totalorder %s1125_s7, %s1577_s3 }
  0x2c   : > { %p1128_p2 = pnand %p1126_p1, %p1099_p12 }
  0x2e   : > { %p1129_p4 = pneg %p1128_p2 }
  0x30   : > { %p1134_p8 = pnand %p1132_p6, %p1129_p4 }
  0x32   : > { %1137 = shalt.err (!%p1134_p8)
}
  0x33   : > { %s1138_s28 = scalar_lea.vmem %s1345_s6, 2048  ;;  %p1146_p3 = scmp.lt.s32.totalorder %s1345_s6, %s1345_s6 }
  0x34   : > { %p1139_p11 = scmp.ne.s32.totalorder %s1345_s6, %s1138_s28  ;;  %p1147_p5 = scmp.lt.s32.totalorder %s1138_s28, %s1138_s28 }
  0x36   : > { %p1141_p13 = pnand %p1139_p11, %p1099_p12  ;;  %p1148_p7 = por %p1147_p5, %p1146_p3 }
  0x38   : > { %p1142_p0 = pneg %p1141_p13 }
  0x3a   : > { %p1149_p9 = pnand %p1148_p7, %p1142_p0 }
  0x3c   : > { %1152 = shalt.err (!%p1149_p9)
}
  0x3d   : > { %1044 = dma.hbm_to_vmem [thread:$0]  (!%p1341_p10), %s1577_s3, 2048, %s1345_s6, [#allocation6], %s1257_s15, %s1257_s15, %s1258_s16  }
  0x3e   : > { %s1401_s29 = sadd.s32 1, %s1253_s21   ;;  %s29_s14 = sadd.s32 1, %s1249_s20 }
  0x3f   : > { %s26_s17 = ssub.s32 %s1253_s21, %s1401_s29  ;;  %p36_p12 = scmp.ne.s32.totalorder %s1249_s20, %s1245_s19 }
  0x40   : > { %p27_p1 = scmp.eq.s32.totalorder %s26_s17, 0  ;;  %p37_p2 = scmp.eq.s32.totalorder %s1253_s21, 0 }
  0x41   : > { %p1587_p4 = scmp.eq.s32.totalorder %s1314_s22, 3  ;;  %p1055_p8 = scmp.lt.s32.totalorder %s1253_s21, 4 }
  0x42   : > { %s1417_s27 = scalar_select %p27_p1, %s1249_s20, %s29_s14  }
  0x43   : > { %p1411_p6 = por %p1587_p4, %p36_p12  ;;  %p38_p11 = por %p37_p2, %p36_p12 }
  0x44   : > { %s208_s30 = sand.u32 1, %s1249_s20   ;;  %s784_s6 = sshll.u32 %s1253_s21, 11 }
  0x45   : > { %s769_s7 = sshll.u32 %s208_s30, 7  ;;  %s1424_s10 = scalar_lea.hbm %s1574_s0, %s784_s6 }
  0x46   : > { %s212_s11 = scalar_lea.vmem [#allocation2], %s769_s7  ;;  %p1428_p10 = pnand %p1055_p8, %p38_p11 }
  0x47   : > { %s219_s28 = sshll.u32 %s212_s11, 4  ;;  %s1432_s13 = scalar_lea.sflag [#allocation3], %s208_s30  ;;  %s1426_s28 = int_to_ptr.vmem [resolvable:$true] %s219_s28 }
  0x48   : > { %s1153_s14 = scalar_lea.hbm %s1424_s10, 2048  ;;  %p1155_p0 = pneg %p1428_p10 }
  0x49   : > { %p1154_p13 = scmp.ne.s32.totalorder %s1424_s10, %s1153_s14  ;;  %s1158_s6 = scalar_lea.hbm %s1574_s0, 8192 }
  0x4a   : > { %p1159_p7 = scmp.lt.u32.totalorder %s1424_s10, %s1574_s0  ;;  %p1160_p9 = scmp.lt.u32.totalorder %s1158_s6, %s1153_s14 }
  0x4b   : > { %p1156_p3 = pnand %p1155_p0, %p1154_p13  ;;  %p1162_p1 = scmp.lt.u32.totalorder %s1153_s14, %s1424_s10 }
  0x4c   : > { %p1161_p12 = por %p1160_p9, %p1159_p7 }
  0x4d   : > { %p1157_p5 = pneg %p1156_p3 }
  0x4e   : > { %p1163_p2 = por %p1162_p1, %p1161_p12 }
  0x50   : > { %p1164_p4 = pnand %p1163_p2, %p1157_p5 }
  0x52   : > { %1167 = shalt.err (!%p1164_p4)
}
  0x53   : > { %s1168_s30 = scalar_lea.vmem %s1426_s28, 2048  ;;  %s1259_s11 = smov [#allocation2]  }
  0x54   : > { %p1169_p8 = scmp.ne.s32.totalorder %s1426_s28, %s1168_s30  ;;  %s1173_s17 = sshll.u32 %s1259_s11, 4  ;;  %s1174_s17 = int_to_ptr.vmem [resolvable:$false] %s1173_s17 }
  0x55   : > { %s1175_s7 = scalar_lea.vmem %s1174_s17, 4096  ;;  %p1176_p3 = scmp.lt.s32.totalorder %s1426_s28, %s1174_s17 }
  0x56   : > { %p1171_p11 = pnand %p1169_p8, %p1155_p0  ;;  %p1177_p7 = scmp.lt.s32.totalorder %s1175_s7, %s1168_s30 }
  0x58   : > { %p1172_p13 = pneg %p1171_p11  ;;  %p1178_p9 = por %p1177_p7, %p1176_p3 }
  0x5a   : > { %p1179_p12 = pnand %p1178_p9, %p1172_p13 }
  0x5c   : > { %1182 = shalt.err (!%p1179_p12)
}
  0x5d   : > { %1048 = dma.hbm_to_vmem [thread:$0]  (!%p1428_p10), %s1424_s10, 2048, %s1426_s28, %s1432_s13, %s1257_s15, %s1257_s15, %s1258_s16  }
  0x5e   : > { %p1590_p0 = scmp.ne.s32.totalorder %s1585_s26, 0 }
  0x5f   : > { %s1466_s14 = sand.u32 (!%p1590_p0), 1, %s1245_s19   ;;  %p1591_p5 = scmp.ne.s32.totalorder (!%p1590_p0), %s1583_s24, 0 }
  0x60   : > { %231 = sbr.rel (%p1590_p0) target bundleno = 618 (0x26a), region = 40  ;;  %s773_s6 = sshll.u32 (!%p1590_p0), %s1466_s14, 7 }
  0x61   : > { %s234_s8 = scalar_lea.sflag (!%p1590_p0), [#allocation3], %s1466_s14  ;;  %s1472_s12 = scalar_lea.vmem (!%p1590_p0), [#allocation2], %s773_s6 }
  0x67   : > { %1228 = dma.done.wait (%p1591_p5), %s234_s8, 2048  }
  0x68   : > { %1230 = vsyncadd (%p1591_p5), %s234_s8, 4294965248  ;;  %p1592_p10 = scmp.eq.s32.totalorder %s1314_s22, 0 }
  0x6a   : > { %1232 = dma.done.wait (%p1592_p10), [#allocation6], 4096   ;;  %p1593_p1 = pmov %p1592_p10 }
  0x6b   : > { %v290_v0 = vld [vmem:[#allocation5] sm:$0xff]  ;;  %v291_v1 = vld [vmem:[#allocation5 + $0x8] sm:$0xff]  ;;  %v292_v2 = vld [vmem:[#allocation5 + $0x10] sm:$0xff]  ;;  %s1506_s10 = scalar_lea.vmem [#allocation8], %s773_s6  ;;  %s785_s28 = sshll.u32 %s1314_s22, 11 }
  0x6c   : > { %1234 = vsyncadd (%p1593_p1), [#allocation6], 4294963200  ;;  %v962_v3 = vpack.c.bf16 %v291_v1, %v290_v0  ;;  %v293_v4 = vld [vmem:[#allocation5 + $0x18] sm:$0xff]  ;;  %v294_v6 = vld [vmem:[#allocation5 + $0x20] sm:$0xff]  ;;  %s672_s13 = sshll.u32 %s1506_s10, 4  ;;  %s1527_s11 = scalar_lea.hbm %s1579_s5, %s785_s28  ;;  %s1529_s13 = int_to_ptr.vmem [resolvable:$true] %s672_s13 }
  0x6d   : > { %v966_v5 = vpack.c.bf16 %v293_v4, %v292_v2  ;;  %v295_v7 = vld [vmem:[#allocation5 + $0x28] sm:$0xff]  ;;  %v274_v9 = vld [vmem:[%s1472_s12] sm:$0xff]  ;;  %v296_v10 = vld [vmem:[#allocation5 + $0x30] sm:$0xff]  ;;  %s659_s22 = scalar_lea.sflag [#allocation4], %s1466_s14  ;;  %s1183_s17 = scalar_lea.vmem %s1529_s13, 2048 }
  0x6e   : > { %963 = vmatprep.subr.bf16.mxu0 %v962_v3  ;;  %v970_v8 = vpack.c.bf16 %v295_v7, %v294_v6  ;;  %v297_v11 = vld [vmem:[#allocation5 + $0x38] sm:$0xff]  ;;  %882 = vmatprep.mubr.f32.mxu0 %v274_v9  ;;  %v298_v13 = vld [vmem:[#allocation5 + $0x40] sm:$0xff]  ;;  %v299_v14 = vld [vmem:[#allocation5 + $0x48] sm:$0xff]  ;;  %p1184_p2 = scmp.ne.s32.totalorder %s1529_s13, %s1183_s17  ;;  %s1260_s7 = smov [#allocation8]  }
  0x6f   : > { %965 = vmatpush3.bf16.msra.mxu0 %v962_v3  ;;  %v974_v12 = vpack.c.bf16 %v297_v11, %v296_v10  ;;  %v474_v15 = vld [vmem:[#allocation7] sm:$0xff]  ;;  %v475_v16 = vld [vmem:[#allocation7 + $0x8] sm:$0xff]  ;;  %v476_v17 = vld [vmem:[#allocation7 + $0x10] sm:$0xff]  ;;  %v978_v21 = vpack.c.bf16 %v299_v14, %v298_v13  ;;  %s1187_s6 = sshll.u32 %s1260_s7, 4  ;;  %s1188_s6 = int_to_ptr.vmem [resolvable:$false] %s1187_s6 }
  0x70   : > { %967 = vmatprep.subr.bf16.mxu0 %v966_v5  ;;  %v477_v18 = vld [vmem:[#allocation7 + $0x18] sm:$0xff]  ;;  %v994_v19 = vpack.c.bf16 %v475_v16, %v474_v15  ;;  %v478_v22 = vld [vmem:[#allocation7 + $0x20] sm:$0xff]  ;;  %v479_v23 = vld [vmem:[#allocation7 + $0x28] sm:$0xff]  ;;  %p1185_p4 = pnand %p1184_p2, %p1411_p6  ;;  %s1189_s8 = scalar_lea.vmem %s1188_s6, 4096 }
  0x71   : > { %v998_v20 = vpack.c.bf16 %v477_v18, %v476_v17  ;;  %v300_v24 = vld [vmem:[#allocation5 + $0x50] sm:$0xff]  ;;  %v301_v25 = vld [vmem:[#allocation5 + $0x58] sm:$0xff]  ;;  %v1002_v26 = vpack.c.bf16 %v479_v23, %v478_v22  ;;  %v302_v30 = vld [vmem:[#allocation5 + $0x60] sm:$0xff]  ;;  %p1190_p11 = scmp.lt.s32.totalorder %s1529_s13, %s1188_s6  ;;  %p1191_p13 = scmp.lt.s32.totalorder %s1189_s8, %s1183_s17 }
  0x72   : > { %995 = vmatprep.subr.bf16.mxu1 %v994_v19  ;;  %v982_v27 = vpack.c.bf16 %v301_v25, %v300_v24  ;;  %v480_v28 = vld [vmem:[#allocation7 + $0x30] sm:$0xff]  ;;  %v481_v29 = vld [vmem:[#allocation7 + $0x38] sm:$0xff]  ;;  %v303_v31 = vld [vmem:[#allocation5 + $0x68] sm:$0xff]  ;;  %p1186_p8 = pneg %p1185_p4 }
  0x73   : > { %969 = vmatpush3.bf16.msra.mxu0 %v966_v5  ;;  %997 = vmatpush3.bf16.msra.mxu1 %v994_v19  ;;  %v1006_v32 = vpack.c.bf16 %v481_v29, %v480_v28  ;;  %v986_v33 = vpack.c.bf16 %v303_v31, %v302_v30  ;;  %v482_v34 = vld [vmem:[#allocation7 + $0x40] sm:$0xff]  ;;  %v483_v35 = vld [vmem:[#allocation7 + $0x48] sm:$0xff]  ;;  %v304_v36 = vld [vmem:[#allocation5 + $0x70] sm:$0xff]  ;;  %p1192_p3 = por %p1191_p13, %p1190_p11 }
  0x74   : > { %971 = vmatprep.subr.bf16.mxu0 %v970_v8  ;;  %999 = vmatprep.subr.bf16.mxu1 %v998_v20  ;;  %v305_v37 = vld [vmem:[#allocation5 + $0x78] sm:$0xff]  ;;  %v1010_v38 = vpack.c.bf16 %v483_v35, %v482_v34  ;;  %v484_v40 = vld [vmem:[#allocation7 + $0x50] sm:$0xff]  ;;  %v486_v43 = vld [vmem:[#allocation7 + $0x60] sm:$0xff] }
  0x75   : > { %v990_v39 = vpack.c.bf16 %v305_v37, %v304_v36  ;;  %v485_v41 = vld [vmem:[#allocation7 + $0x58] sm:$0xff]  ;;  %v487_v44 = vld [vmem:[#allocation7 + $0x68] sm:$0xff]  ;;  %v276_v47 = vld [vmem:[%s1472_s12 + $0x10] sm:$0xff]  ;;  %p1193_p7 = pnand %p1192_p3, %p1186_p8 }
  0x76   : > { %v1014_v42 = vpack.c.bf16 %v485_v41, %v484_v40  ;;  %v275_v45 = vld [vmem:[%s1472_s12 + $0x8] sm:$0xff]  ;;  %v1018_v46 = vpack.c.bf16 %v487_v44, %v486_v43  ;;  %v277_v48 = vld [vmem:[%s1472_s12 + $0x18] sm:$0xff]  ;;  %v278_v49 = vld [vmem:[%s1472_s12 + $0x20] sm:$0xff] }
  0x77   : > { %973 = vmatpush3.bf16.msra.mxu0 %v970_v8  ;;  %1001 = vmatpush3.bf16.msra.mxu1 %v998_v20  ;;  %v279_v50 = vld [vmem:[%s1472_s12 + $0x28] sm:$0xff]  ;;  %v280_v51 = vld [vmem:[%s1472_s12 + $0x30] sm:$0xff]  ;;  %v281_v52 = vld [vmem:[%s1472_s12 + $0x38] sm:$0xff] }
  0x78   : > { %975 = vmatprep.subr.bf16.mxu0 %v974_v12  ;;  %1003 = vmatprep.subr.bf16.mxu1 %v1002_v26  ;;  %v282_v53 = vld [vmem:[%s1472_s12 + $0x40] sm:$0xff]  ;;  %v283_v54 = vld [vmem:[%s1472_s12 + $0x48] sm:$0xff]  ;;  %v284_v55 = vld [vmem:[%s1472_s12 + $0x50] sm:$0xff] }
  0x79   : > { %v285_v56 = vld [vmem:[%s1472_s12 + $0x58] sm:$0xff]  ;;  %v286_v57 = vld [vmem:[%s1472_s12 + $0x60] sm:$0xff]  ;;  %v287_v58 = vld [vmem:[%s1472_s12 + $0x68] sm:$0xff] }
  0x7a   : > { %v288_v59 = vld [vmem:[%s1472_s12 + $0x70] sm:$0xff]  ;;  %v289_v60 = vld [vmem:[%s1472_s12 + $0x78] sm:$0xff]  ;;  %v777_v0 = vld [vmem:[%s1576_s2] ss:$0 sm:$0xff] }
  0x7b   : > { %977 = vmatpush3.bf16.msra.mxu0 %v974_v12  ;;  %1005 = vmatpush3.bf16.msra.mxu1 %v1002_v26  ;;  %v488_v61 = vld [vmem:[#allocation7 + $0x70] sm:$0xff]  ;;  %v489_v62 = vld [vmem:[#allocation7 + $0x78] sm:$0xff] }
  0x7c   : > { %979 = vmatprep.subr.bf16.mxu0 %v978_v21  ;;  %1007 = vmatprep.subr.bf16.mxu1 %v1006_v32  ;;  %v1022_v63 = vpack.c.bf16 %v489_v62, %v488_v61 }
  0x7f   : > { %981 = vmatpush3.bf16.msra.mxu0 %v978_v21  ;;  %1009 = vmatpush3.bf16.msra.mxu1 %v1006_v32 }
  0x80   : > { %983 = vmatprep.subr.bf16.mxu0 %v982_v27  ;;  %1011 = vmatprep.subr.bf16.mxu1 %v1010_v38 }
  0x83   : > { %985 = vmatpush3.bf16.msra.mxu0 %v982_v27  ;;  %1013 = vmatpush3.bf16.msra.mxu1 %v1010_v38 }
  0x84   : > { %987 = vmatprep.subr.bf16.mxu0 %v986_v33  ;;  %1015 = vmatprep.subr.bf16.mxu1 %v1014_v42 }
  0x87   : > { %989 = vmatpush3.bf16.msra.mxu0 %v986_v33  ;;  %1017 = vmatpush3.bf16.msra.mxu1 %v1014_v42 }
  0x88   : > { %991 = vmatprep.subr.bf16.mxu0 %v990_v39  ;;  %1019 = vmatprep.subr.bf16.mxu1 %v1018_v46 }
  0x8b   : > { %993 = vmatpush3.bf16.msra.mxu0 %v990_v39  ;;  %1021 = vmatpush3.bf16.msra.mxu1 %v1018_v46 }
  0x8c   : > { %1023 = vmatprep.subr.bf16.mxu1 %v1022_v63 }
  0x8e   : > { %883 = vmatmul.mubr.f32.vlgmr.msra.gmra.mrb[0].mxu0 %v275_v45 }
  0x8f   : > { %885 = vmatprep.mubr.f32.mxu0 %v276_v47  ;;  %1025 = vmatpush3.bf16.msra.mxu1 %v1022_v63 }
  0x92   : > { %886 = vmatmul.mubr.f32.gmra.mrb[2].mxu0 %v277_v48 }
  0x93   : > { %888 = vmatprep.mubr.f32.mxu0 %v278_v49  ;;  %v778_v49 = vld [vmem:[%s1578_s4] ss:$0 sm:$0xff] }
  0x96   : > { %889 = vmatmul.mubr.f32.gmra.mrb[4].mxu0 %v279_v50 }
  0x97   : > { %891 = vmatprep.mubr.f32.mxu0 %v280_v51 }
  0x9a   : > { %892 = vmatmul.mubr.f32.gmra.mrb[6].mxu0 %v281_v52 }
  0x9b   : > { %894 = vmatprep.mubr.f32.mxu0 %v282_v53 }
  0x9e   : > { %895 = vmatmul.mubr.f32.gmra.mrb[8].mxu0 %v283_v54 }
  0x9f   : > { %897 = vmatprep.mubr.f32.mxu0 %v284_v55 }
  0xa2   : > { %898 = vmatmul.mubr.f32.gmra.mrb[10].mxu0 %v285_v56 }
  0xa3   : > { %900 = vmatprep.mubr.f32.mxu0 %v286_v57 }
  0xa6   : > { %901 = vmatmul.mubr.f32.gmra.mrb[12].mxu0 %v287_v58 }
  0xa7   : > { %903 = vmatprep.mubr.f32.mxu0 %v288_v59 }
  0xaa   : > { %904 = vmatmul.mubr.f32.gmra.mrb[14].mxu0 %v289_v60 }
 0x161   : > { %v884_v1 = vpop.f32.mrb[0].mxu0 }
 0x162   : > { %v385_v2 = vadd.f32 %v884_v1, %v777_v0  ;;  %v379_v3 = vpop.f32.mrb[1].mxu0 }
 0x163   : > { %v380_v4 = vadd.f32 %v777_v0, %v379_v3 }
 0x164   : > { %v459_v7 = vmax.f32 %v385_v2, 0.0 }
 0x165   : > { %v887_v5 = vpop.f32.mrb[2].mxu0  ;;  %v458_v6 = vmax.f32 %v380_v4, 0.0 }
 0x166   : > { %v395_v8 = vadd.f32 %v887_v5, %v777_v0  ;;  %v389_v9 = vpop.f32.mrb[3].mxu0 }
 0x167   : > { %v390_v10 = vadd.f32 %v777_v0, %v389_v9  ;;  %938 = vmatprep.mubr.f32.mxu1 %v458_v6 }
 0x168   : > { %939 = vmatmul.mubr.f32.vlgmr.msra.gmra.mrb[0].mxu1 %v459_v7  ;;  %v461_v13 = vmax.f32 %v395_v8, 0.0 }
 0x169   : > { %v460_v11 = vmax.f32 %v390_v10, 0.0  ;;  %v890_v12 = vpop.f32.mrb[4].mxu0 }
 0x16a   : > { %v405_v14 = vadd.f32 %v890_v12, %v777_v0  ;;  %v399_v15 = vpop.f32.mrb[5].mxu0 }
 0x16b   : > { %v400_v16 = vadd.f32 %v777_v0, %v399_v15  ;;  %941 = vmatprep.mubr.f32.mxu1 %v460_v11 }
 0x16c   : > { %942 = vmatmul.mubr.f32.gmra.mrb[2].mxu1 %v461_v13  ;;  %v463_v19 = vmax.f32 %v405_v14, 0.0 }
 0x16d   : > { %v462_v17 = vmax.f32 %v400_v16, 0.0  ;;  %v893_v18 = vpop.f32.mrb[6].mxu0 }
 0x16e   : > { %v415_v20 = vadd.f32 %v893_v18, %v777_v0  ;;  %v409_v21 = vpop.f32.mrb[7].mxu0 }
 0x16f   : > { %v410_v22 = vadd.f32 %v777_v0, %v409_v21  ;;  %944 = vmatprep.mubr.f32.mxu1 %v462_v17 }
 0x170   : > { %945 = vmatmul.mubr.f32.gmra.mrb[4].mxu1 %v463_v19  ;;  %v465_v25 = vmax.f32 %v415_v20, 0.0 }
 0x171   : > { %v464_v23 = vmax.f32 %v410_v22, 0.0  ;;  %v896_v24 = vpop.f32.mrb[8].mxu0 }
 0x172   : > { %v425_v26 = vadd.f32 %v896_v24, %v777_v0  ;;  %v419_v27 = vpop.f32.mrb[9].mxu0 }
 0x173   : > { %v420_v28 = vadd.f32 %v777_v0, %v419_v27  ;;  %947 = vmatprep.mubr.f32.mxu1 %v464_v23 }
 0x174   : > { %948 = vmatmul.mubr.f32.gmra.mrb[6].mxu1 %v465_v25  ;;  %v467_v31 = vmax.f32 %v425_v26, 0.0 }
 0x175   : > { %v466_v29 = vmax.f32 %v420_v28, 0.0  ;;  %v899_v30 = vpop.f32.mrb[10].mxu0 }
 0x176   : > { %v435_v32 = vadd.f32 %v899_v30, %v777_v0  ;;  %v429_v33 = vpop.f32.mrb[11].mxu0 }
 0x177   : > { %v430_v34 = vadd.f32 %v777_v0, %v429_v33  ;;  %950 = vmatprep.mubr.f32.mxu1 %v466_v29 }
 0x178   : > { %951 = vmatmul.mubr.f32.gmra.mrb[8].mxu1 %v467_v31  ;;  %v469_v37 = vmax.f32 %v435_v32, 0.0 }
 0x179   : > { %v468_v35 = vmax.f32 %v430_v34, 0.0  ;;  %v902_v36 = vpop.f32.mrb[12].mxu0 }
 0x17a   : > { %v445_v38 = vadd.f32 %v902_v36, %v777_v0  ;;  %v439_v39 = vpop.f32.mrb[13].mxu0 }
 0x17b   : > { %v440_v40 = vadd.f32 %v777_v0, %v439_v39  ;;  %953 = vmatprep.mubr.f32.mxu1 %v468_v35 }
 0x17c   : > { %954 = vmatmul.mubr.f32.gmra.mrb[10].mxu1 %v469_v37  ;;  %v471_v43 = vmax.f32 %v445_v38, 0.0 }
 0x17d   : > { %v470_v41 = vmax.f32 %v440_v40, 0.0  ;;  %v905_v42 = vpop.f32.mrb[14].mxu0 }
 0x17e   : > { %v455_v44 = vadd.f32 %v905_v42, %v777_v0  ;;  %v449_v45 = vpop.f32.mrb[15].mxu0 }
 0x17f   : > { %v450_v46 = vadd.f32 %v777_v0, %v449_v45  ;;  %956 = vmatprep.mubr.f32.mxu1 %v470_v41 }
 0x180   : > { %957 = vmatmul.mubr.f32.gmra.mrb[12].mxu1 %v471_v43  ;;  %v473_v48 = vmax.f32 %v455_v44, 0.0 }
 0x181   : > { %v472_v47 = vmax.f32 %v450_v46, 0.0 }
 0x183   : > { %959 = vmatprep.mubr.f32.mxu1 %v472_v47 }
 0x184   : > { %960 = vmatmul.mubr.f32.gmra.mrb[14].mxu1 %v473_v48 }
 0x23b   : > { %v940_v50 = vpop.f32.mrb[0].mxu1 }
 0x23c   : > { %v569_v51 = vadd.f32 %v940_v50, %v778_v49  ;;  %v563_v52 = vpop.f32.mrb[1].mxu1 }
 0x23d   : > { %v564_v53 = vadd.f32 %v778_v49, %v563_v52 }
 0x23e   : > { %643 = vst [vmem:[%s1506_s10 + $0x8] sm:$0xff] %v569_v51 }
 0x23f   : > { %642 = vst [vmem:[%s1506_s10] sm:$0xff] %v564_v53  ;;  %v943_v54 = vpop.f32.mrb[2].mxu1 }
 0x240   : > { %v579_v55 = vadd.f32 %v943_v54, %v778_v49  ;;  %v573_v56 = vpop.f32.mrb[3].mxu1 }
 0x241   : > { %v574_v57 = vadd.f32 %v778_v49, %v573_v56 }
 0x242   : > { %645 = vst [vmem:[%s1506_s10 + $0x18] sm:$0xff] %v579_v55 }
 0x243   : > { %644 = vst [vmem:[%s1506_s10 + $0x10] sm:$0xff] %v574_v57  ;;  %v946_v58 = vpop.f32.mrb[4].mxu1 }
 0x244   : > { %v589_v59 = vadd.f32 %v946_v58, %v778_v49  ;;  %v583_v60 = vpop.f32.mrb[5].mxu1 }
 0x245   : > { %v584_v61 = vadd.f32 %v778_v49, %v583_v60 }
 0x246   : > { %647 = vst [vmem:[%s1506_s10 + $0x28] sm:$0xff] %v589_v59 }
 0x247   : > { %646 = vst [vmem:[%s1506_s10 + $0x20] sm:$0xff] %v584_v61  ;;  %v949_v62 = vpop.f32.mrb[6].mxu1 }
 0x248   : > { %v599_v63 = vadd.f32 %v949_v62, %v778_v49  ;;  %v593_v0 = vpop.f32.mrb[7].mxu1 }
 0x249   : > { %v594_v1 = vadd.f32 %v778_v49, %v593_v0 }
 0x24a   : > { %649 = vst [vmem:[%s1506_s10 + $0x38] sm:$0xff] %v599_v63 }
 0x24b   : > { %648 = vst [vmem:[%s1506_s10 + $0x30] sm:$0xff] %v594_v1  ;;  %v952_v2 = vpop.f32.mrb[8].mxu1 }
 0x24c   : > { %v609_v3 = vadd.f32 %v952_v2, %v778_v49  ;;  %v603_v4 = vpop.f32.mrb[9].mxu1 }
 0x24d   : > { %v604_v5 = vadd.f32 %v778_v49, %v603_v4 }
 0x24e   : > { %651 = vst [vmem:[%s1506_s10 + $0x48] sm:$0xff] %v609_v3 }
 0x24f   : > { %650 = vst [vmem:[%s1506_s10 + $0x40] sm:$0xff] %v604_v5  ;;  %v955_v6 = vpop.f32.mrb[10].mxu1 }
 0x250   : > { %v619_v7 = vadd.f32 %v955_v6, %v778_v49  ;;  %v613_v8 = vpop.f32.mrb[11].mxu1 }
 0x251   : > { %v614_v9 = vadd.f32 %v778_v49, %v613_v8 }
 0x252   : > { %653 = vst [vmem:[%s1506_s10 + $0x58] sm:$0xff] %v619_v7 }
 0x253   : > { %652 = vst [vmem:[%s1506_s10 + $0x50] sm:$0xff] %v614_v9  ;;  %v958_v10 = vpop.f32.mrb[12].mxu1 }
 0x254   : > { %v629_v11 = vadd.f32 %v958_v10, %v778_v49  ;;  %v623_v12 = vpop.f32.mrb[13].mxu1 }
 0x255   : > { %v624_v13 = vadd.f32 %v778_v49, %v623_v12 }
 0x256   : > { %655 = vst [vmem:[%s1506_s10 + $0x68] sm:$0xff] %v629_v11 }
 0x257   : > { %654 = vst [vmem:[%s1506_s10 + $0x60] sm:$0xff] %v624_v13  ;;  %v961_v14 = vpop.f32.mrb[14].mxu1 }
 0x258   : > { %v639_v15 = vadd.f32 %v961_v14, %v778_v49  ;;  %v633_v16 = vpop.f32.mrb[15].mxu1 }
 0x259   : > { %v634_v17 = vadd.f32 %v778_v49, %v633_v16 }
 0x25a   : > { %657 = vst [vmem:[%s1506_s10 + $0x78] sm:$0xff] %v639_v15 }
 0x25b   : > { %656 = vst [vmem:[%s1506_s10 + $0x70] sm:$0xff] %v634_v17 }
 0x25c   : > { %1196 = shalt.err (!%p1193_p7)
}
 0x25d   : > { %s1197_s12 = scalar_lea.hbm %s1527_s11, 2048  ;;  %s1201_s15 = scalar_lea.hbm %s1579_s5, 8192 }
 0x25e   : > { %p1198_p9 = scmp.ne.s32.totalorder %s1527_s11, %s1197_s12  ;;  %p1202_p5 = scmp.lt.u32.totalorder %s1527_s11, %s1579_s5 }
 0x25f   : > { %p1203_p10 = scmp.lt.u32.totalorder %s1201_s15, %s1197_s12  ;;  %p1205_p2 = scmp.lt.u32.totalorder %s1197_s12, %s1527_s11 }
 0x260   : > { %p1199_p12 = pnand %p1198_p9, %p1411_p6 }
 0x261   : > { %p1204_p1 = por %p1203_p10, %p1202_p5 }
 0x262   : > { %p1200_p0 = pneg %p1199_p12 }
 0x263   : > { %p1206_p4 = por %p1205_p2, %p1204_p1 }
 0x265   : > { %p1207_p8 = pnand %p1206_p4, %p1200_p0 }
 0x267   : > { %1210 = shalt.err (!%p1207_p8)
}
 0x268   : > { %s1261_s28 = smov 128   ;;  %s1262_s9 = smov 8  }
 0x269   : > { %1036 = dma.vmem_to_hbm [thread:$0]  (%p1411_p6), %s1529_s13, 2048, %s1527_s11, %s659_s22, %s1261_s28, %s1261_s28, %s1262_s9  }
 0x26a PF: > { %p1058_p11 = scmp.ge.s32.totalorder %s1253_s21, 2  ;;  %s687_s30 = sand.u32 1, %s1241_s18  }
 0x26b   : > { %p1594_p13 = scmp.ne.s32.totalorder %s1584_s25, 0  ;;  %s688_s17 = scalar_lea.sflag [#allocation4], %s687_s30 }
 0x26d   : > { %p1050_p3 = pnand %p1058_p11, %p1594_p13 }
 0x26f   : > { %1236 = dma.done.wait (!%p1050_p3), %s688_s17, 2048  }
 0x270   : > { %1238 = vsyncadd (!%p1050_p3), %s688_s17, 4294965248  ;;  %p19_p7 = scmp.ge.s32.totalorder %s1401_s29, 6   ;;  %s1595_s18 = smov %s1245_s19 }
 0x271   : > { %s1596_s19 = smov %s1249_s20  ;;  %s1597_s20 = smov %s1417_s27 }
 0x272   : > { %s1598_s21 = smov %s1401_s29  ;;  %21 = sbr.rel (!%p19_p7) target bundleno = 6 (0x6), region = 93 }
 0x279   :  { %693 = vsyncpa [#allocation3], 1 }
 0x27a   :  { %695 = vsyncpa [#allocation3 + $0x1], 1 }
 0x27b   :  { %696 = vsyncpa [#allocation6], 1 }
 0x27c   :  { %697 = vsyncpa [#allocation4], 1 }
 0x27d   :  { %699 = vsyncpa [#allocation4 + $0x1], 1 }

</bundles_post_ra>
